<compile_context>
chip_gen: v7x
topology: tpu7x:2x2x1
jax: 0.10.0
libtpu: 0.0.40
codegen_flags: <defaults>
</compile_context>

<pallas_src>
import functools

import jax
import jax.numpy as jnp
from jax import lax
from jax.experimental import pallas as pl
from jax.experimental.pallas import tpu as pltpu


LANE = 128        # lane width
SUB_ROWS = 128    # rows per inner MXU pass (sub-tile of the grid block)


def _round_up(n, m):
    return ((n + m - 1) // m) * m


def _mlp_subtile(x_blk, w1, b1, w2, b2, w3, b3, w4, b4, out_dtype):
    """One (sub_tb, D_in) slab through the 4-layer MLP. f32 accumulation."""
    xb = x_blk.astype(jnp.bfloat16)
    h = jnp.dot(xb, w1, preferred_element_type=jnp.float32)
    h = jnp.maximum(h + b1, 0.0)
    h = jnp.dot(h.astype(jnp.bfloat16), w2, preferred_element_type=jnp.float32)
    h = jnp.maximum(h + b2, 0.0)
    h = jnp.dot(h.astype(jnp.bfloat16), w3, preferred_element_type=jnp.float32)
    h = jnp.maximum(h + b3, 0.0)
    out = jnp.dot(h.astype(jnp.bfloat16), w4, preferred_element_type=jnp.float32)
    return (out + b4).astype(out_dtype)


def policy_mlp_kernel(x_ref,
                      w1_ref, b1_ref,
                      w2_ref, b2_ref,
                      w3_ref, b3_ref,
                      w4_ref, b4_ref,
                      o_ref, *, sub_tb, n_sub):
    # Load (tiny) resident weights/biases once per grid step.
    w1 = w1_ref[...]; b1 = b1_ref[...]
    w2 = w2_ref[...]; b2 = b2_ref[...]
    w3 = w3_ref[...]; b3 = b3_ref[...]
    w4 = w4_ref[...]; b4 = b4_ref[...]

    def body(s, carry):
        r = pl.multiple_of(s * sub_tb, sub_tb)
        x_blk = x_ref[pl.ds(r, sub_tb), :]
        o_ref[pl.ds(r, sub_tb), :] = _mlp_subtile(
            x_blk, w1, b1, w2, b2, w3, b3, w4, b4, o_ref.dtype)
        return carry

    lax.fori_loop(0, n_sub, body, 0, unroll=True)


def _choose_tiles(B, tile_b):
    """Pick (grid block rows, inner sub-tile rows)."""
    tb = min(tile_b, _round_up(B, 8))
    # Keep >= 2 grid steps when the batch allows it (megacore split on v7x).
    if B > SUB_ROWS:
        half = _round_up(-(-B // 2), SUB_ROWS)
        tb = min(tb, max(SUB_ROWS, half))
    sub = min(SUB_ROWS, _round_up(tb, 8))
    tb = _round_up(tb, sub)
    return tb, sub


def init_params(dim_input, dim_hidden, dim_output, key):
    """nn.Linear-style uniform(-1/sqrt(fan_in), 1/sqrt(fan_in)) init (f32)."""
    dims = [(dim_input, dim_hidden),
            (dim_hidden, 2 * dim_hidden),
            (2 * dim_hidden, dim_hidden),
            (dim_hidden, dim_output)]
    params = {}
    for idx, (din, dout) in enumerate(dims, start=1):
        key, kw, kb = jax.random.split(key, 3)
        bound = 1.0 / jnp.sqrt(din)
        params[f"w{idx}"] = jax.random.uniform(
            kw, (din, dout), jnp.float32, minval=-bound, maxval=bound)
        params[f"b{idx}"] = jax.random.uniform(
            kb, (1, dout), jnp.float32, minval=-bound, maxval=bound)
    return params


def prepare_params(params):
    """One-time cast/pad into kernel layout (call once per parameter update)."""
    dim_output = params["w4"].shape[1]
    n_pad = _round_up(max(dim_output, LANE), LANE)
    kp = {}
    for i in (1, 2, 3):
        kp[f"w{i}"] = params[f"w{i}"].astype(jnp.bfloat16)
        kp[f"b{i}"] = params[f"b{i}"].astype(jnp.float32)
    kp["w4"] = jnp.pad(params["w4"],
                       ((0, 0), (0, n_pad - dim_output))).astype(jnp.bfloat16)
    kp["b4"] = jnp.pad(params["b4"],
                       ((0, 0), (0, n_pad - dim_output))).astype(jnp.float32)
    return kp


@functools.partial(jax.jit, static_argnames=("dim_output", "tile_b"))
def policy_forward(x, kparams, *, dim_output, tile_b=256):
    """Fused Policy MLP forward.

    x: (B, D_in) f32 (native dtype; cast to bf16 inside the kernel).
    kparams: output of prepare_params (bf16 weights, padded head).
    Returns (B, dim_output) f32 logits.
    """
    B, D_in = x.shape
    N_pad = kparams["w4"].shape[1]

    tb, sub = _choose_tiles(B, tile_b)
    n_sub = tb // sub
    B_pad = _round_up(B, tb)
    n_tiles = B_pad // tb

    x_in = x if B_pad == B else jnp.pad(x, ((0, B_pad - B), (0, 0)))

    # Weights/biases: full-array blocks, same block every grid step
    # -> fetched once, VMEM-resident across the batch loop.
    resident = lambda a: pl.BlockSpec(a.shape, lambda i: (0, 0))

    args = (x_in,
            kparams["w1"], kparams["b1"],
            kparams["w2"], kparams["b2"],
            kparams["w3"], kparams["b3"],
            kparams["w4"], kparams["b4"])
    in_specs = [pl.BlockSpec((tb, D_in), lambda i: (i, 0))] + [
        resident(a) for a in args[1:]
    ]

    kernel = functools.partial(policy_mlp_kernel, sub_tb=sub, n_sub=n_sub)

    out = pl.pallas_call(
        kernel,
        # bf16 output halves the padded-head writeback (largest HBM stream).
        out_shape=jax.ShapeDtypeStruct((B_pad, N_pad), jnp.bfloat16),
        grid_spec=pltpu.PrefetchScalarGridSpec(
            num_scalar_prefetch=0,
            grid=(n_tiles,),
            in_specs=in_specs,
            out_specs=pl.BlockSpec((tb, N_pad), lambda i: (i, 0)),
        ),
        compiler_params=pltpu.CompilerParams(
            dimension_semantics=("parallel",),      # megacore split on v7x
            vmem_limit_bytes=32 * 1024 * 1024,      # safe under v7x's 64 MiB VMEM
        ),
    )(*args)

    return out[:B, :dim_output].astype(jnp.float32)


def policy_forward_ref(x, p):
    """Plain-JAX reference, mirroring the intentional bf16-operand matmuls."""
    def lin(h, w, b):
        return jnp.dot(h.astype(jnp.bfloat16), w.astype(jnp.bfloat16),
                       preferred_element_type=jnp.float32) + b
    h = jnp.maximum(lin(x, p["w1"], p["b1"]), 0.0)
    h = jnp.maximum(lin(h, p["w2"], p["b2"]), 0.0)
    h = jnp.maximum(lin(h, p["w3"], p["b3"]), 0.0)
    return lin(h, p["w4"], p["b4"])


if __name__ == "__main__":
    key = jax.random.PRNGKey(0)
    # batch=512 (2 grid tiles of 256 rows, each = 2 unrolled 128-row sub-tiles),
    # dim_input=16, dim_hidden=32, dim_output=4 (action logits).
    B, D_IN, H, DIM_OUT = 512, 16, 32, 4

    kx, kp = jax.random.split(key)
    x = jax.random.normal(kx, (B, D_IN), jnp.float32)
    params = init_params(D_IN, H, DIM_OUT, kp)
    kparams = prepare_params(params)   # one-time cast/pad, reused every call

    out = policy_forward(x, kparams, dim_output=DIM_OUT, tile_b=256)
    out = jax.block_until_ready(out)

    ref = policy_forward_ref(x, params)
    assert out.shape == (B, DIM_OUT), out.shape
    # bf16 weights + bf16 output store -> ~1e-2-level agreement with f32 ref.
    assert jnp.allclose(out, ref, atol=1e-2, rtol=1e-2), (
        float(jnp.max(jnp.abs(out - ref))))

    # TODO(synk): take_action (Categorical sampling) and get_logp (log-softmax
    # gather) are left to host-side JAX; only the mlp forward is kernelized.
    print("KERNEL_OK")
</pallas_src>

<mosaic_0001>
module attributes {stable_mosaic.version = 11 : i64} {
  func.func @policy_mlp_kernel(%arg0: i32, %arg1: memref<256x16xf32, #tpu.memory_space<vmem>>, %arg2: memref<16x32xbf16, #tpu.memory_space<vmem>>, %arg3: memref<1x32xf32, #tpu.memory_space<vmem>>, %arg4: memref<32x64xbf16, #tpu.memory_space<vmem>>, %arg5: memref<1x64xf32, #tpu.memory_space<vmem>>, %arg6: memref<64x32xbf16, #tpu.memory_space<vmem>>, %arg7: memref<1x32xf32, #tpu.memory_space<vmem>>, %arg8: memref<32x128xbf16, #tpu.memory_space<vmem>>, %arg9: memref<1x128xf32, #tpu.memory_space<vmem>>, %arg10: memref<256x128xbf16, #tpu.memory_space<vmem>>) attributes {dimension_semantics = [#tpu.dimension_semantics<parallel>], iteration_bounds = array<i64: 2>, scalar_prefetch = 0 : i64, scratch_operands = 0 : i64, tpu.core_type = #tpu.core_type<tc>, window_params = [{transform_indices = @transform_0, window_bounds = array<i64: 256, 16>}, {pipeline_mode = #tpu.pipeline_mode<synchronous>, transform_indices = @transform_1, window_bounds = array<i64: 16, 32>}, {pipeline_mode = #tpu.pipeline_mode<synchronous>, transform_indices = @transform_2, window_bounds = array<i64: 1, 32>}, {pipeline_mode = #tpu.pipeline_mode<synchronous>, transform_indices = @transform_3, window_bounds = array<i64: 32, 64>}, {pipeline_mode = #tpu.pipeline_mode<synchronous>, transform_indices = @transform_4, window_bounds = array<i64: 1, 64>}, {pipeline_mode = #tpu.pipeline_mode<synchronous>, transform_indices = @transform_5, window_bounds = array<i64: 64, 32>}, {pipeline_mode = #tpu.pipeline_mode<synchronous>, transform_indices = @transform_6, window_bounds = array<i64: 1, 32>}, {pipeline_mode = #tpu.pipeline_mode<synchronous>, transform_indices = @transform_7, window_bounds = array<i64: 32, 128>}, {pipeline_mode = #tpu.pipeline_mode<synchronous>, transform_indices = @transform_8, window_bounds = array<i64: 1, 128>}, {transform_indices = @transform_9, window_bounds = array<i64: 256, 128>}]} {
    %c0 = arith.constant 0 : index
    %c0_0 = arith.constant 0 : index
    %0 = vector.load %arg2[%c0, %c0_0] : memref<16x32xbf16, #tpu.memory_space<vmem>>, vector<16x32xbf16>
    %c0_1 = arith.constant 0 : index
    %c0_2 = arith.constant 0 : index
    %1 = vector.load %arg3[%c0_1, %c0_2] : memref<1x32xf32, #tpu.memory_space<vmem>>, vector<1x32xf32>
    %c0_3 = arith.constant 0 : index
    %c0_4 = arith.constant 0 : index
    %2 = vector.load %arg4[%c0_3, %c0_4] : memref<32x64xbf16, #tpu.memory_space<vmem>>, vector<32x64xbf16>
    %c0_5 = arith.constant 0 : index
    %c0_6 = arith.constant 0 : index
    %3 = vector.load %arg5[%c0_5, %c0_6] : memref<1x64xf32, #tpu.memory_space<vmem>>, vector<1x64xf32>
    %c0_7 = arith.constant 0 : index
    %c0_8 = arith.constant 0 : index
    %4 = vector.load %arg6[%c0_7, %c0_8] : memref<64x32xbf16, #tpu.memory_space<vmem>>, vector<64x32xbf16>
    %c0_9 = arith.constant 0 : index
    %c0_10 = arith.constant 0 : index
    %5 = vector.load %arg7[%c0_9, %c0_10] : memref<1x32xf32, #tpu.memory_space<vmem>>, vector<1x32xf32>
    %c0_11 = arith.constant 0 : index
    %c0_12 = arith.constant 0 : index
    %6 = vector.load %arg8[%c0_11, %c0_12] : memref<32x128xbf16, #tpu.memory_space<vmem>>, vector<32x128xbf16>
    %c0_13 = arith.constant 0 : index
    %c0_14 = arith.constant 0 : index
    %7 = vector.load %arg9[%c0_13, %c0_14] : memref<1x128xf32, #tpu.memory_space<vmem>>, vector<1x128xf32>
    %c0_i32 = arith.constant 0 : i32
    %c128_i32 = arith.constant 128 : i32
    %8 = arith.muli %c0_i32, %c128_i32 : i32
    %9 = tpu.assume_multiple %8, 128 : i32
    %10 = arith.index_cast %9 : i32 to index
    %c0_15 = arith.constant 0 : index
    %11 = vector.load %arg1[%10, %c0_15] : memref<256x16xf32, #tpu.memory_space<vmem>>, vector<128x16xf32>
    %12 = arith.truncf %11 : vector<128x16xf32> to vector<128x16xbf16>
    %cst = arith.constant dense<0.000000e+00> : vector<128x32xf32>
    %13 = tpu.matmul %12, %0, %cst {dimension_numbers = #tpu.dot_dimension_numbers<[1], [0], [0], [1], [0, 0, 1, 1], [], []>} : vector<128x16xbf16>, vector<16x32xbf16>, vector<128x32xf32> -> vector<128x32xf32>
    %14 = vector.broadcast %1 : vector<1x32xf32> to vector<128x32xf32>
    %15 = arith.addf %13, %14 : vector<128x32xf32>
    %cst_16 = arith.constant 0.000000e+00 : f32
    %16 = vector.broadcast %cst_16 : f32 to vector<128x32xf32>
    %17 = arith.maximumf %15, %16 : vector<128x32xf32>
    %18 = arith.truncf %17 : vector<128x32xf32> to vector<128x32xbf16>
    %cst_17 = arith.constant dense<0.000000e+00> : vector<128x64xf32>
    %19 = tpu.matmul %18, %2, %cst_17 {dimension_numbers = #tpu.dot_dimension_numbers<[1], [0], [0], [1], [0, 0, 1, 1], [], []>} : vector<128x32xbf16>, vector<32x64xbf16>, vector<128x64xf32> -> vector<128x64xf32>
    %20 = vector.broadcast %3 : vector<1x64xf32> to vector<128x64xf32>
    %21 = arith.addf %19, %20 : vector<128x64xf32>
    %cst_18 = arith.constant 0.000000e+00 : f32
    %22 = vector.broadcast %cst_18 : f32 to vector<128x64xf32>
    %23 = arith.maximumf %21, %22 : vector<128x64xf32>
    %24 = arith.truncf %23 : vector<128x64xf32> to vector<128x64xbf16>
    %cst_19 = arith.constant dense<0.000000e+00> : vector<128x32xf32>
    %25 = tpu.matmul %24, %4, %cst_19 {dimension_numbers = #tpu.dot_dimension_numbers<[1], [0], [0], [1], [0, 0, 1, 1], [], []>} : vector<128x64xbf16>, vector<64x32xbf16>, vector<128x32xf32> -> vector<128x32xf32>
    %26 = vector.broadcast %5 : vector<1x32xf32> to vector<128x32xf32>
    %27 = arith.addf %25, %26 : vector<128x32xf32>
    %cst_20 = arith.constant 0.000000e+00 : f32
    %28 = vector.broadcast %cst_20 : f32 to vector<128x32xf32>
    %29 = arith.maximumf %27, %28 : vector<128x32xf32>
    %30 = arith.truncf %29 : vector<128x32xf32> to vector<128x32xbf16>
    %cst_21 = arith.constant dense<0.000000e+00> : vector<128x128xf32>
    %31 = tpu.matmul %30, %6, %cst_21 {dimension_numbers = #tpu.dot_dimension_numbers<[1], [0], [0], [1], [0, 0, 1, 1], [], []>} : vector<128x32xbf16>, vector<32x128xbf16>, vector<128x128xf32> -> vector<128x128xf32>
    %32 = vector.broadcast %7 : vector<1x128xf32> to vector<128x128xf32>
    %33 = arith.addf %31, %32 : vector<128x128xf32>
    %34 = arith.truncf %33 : vector<128x128xf32> to vector<128x128xbf16>
    %35 = arith.index_cast %9 : i32 to index
    %c0_22 = arith.constant 0 : index
    %36 = vector.load %arg10[%35, %c0_22] : memref<256x128xbf16, #tpu.memory_space<vmem>>, vector<128x128xbf16>
    tpu.vector_store %arg10[%35, %c0_22], %34 {strides = array<i32>} : memref<256x128xbf16, #tpu.memory_space<vmem>>, vector<128x128xbf16>,
    %c1_i32 = arith.constant 1 : i32
    %c128_i32_23 = arith.constant 128 : i32
    %37 = arith.muli %c1_i32, %c128_i32_23 : i32
    %38 = tpu.assume_multiple %37, 128 : i32
    %39 = arith.index_cast %38 : i32 to index
    %c0_24 = arith.constant 0 : index
    %40 = vector.load %arg1[%39, %c0_24] : memref<256x16xf32, #tpu.memory_space<vmem>>, vector<128x16xf32>
    %41 = arith.truncf %40 : vector<128x16xf32> to vector<128x16xbf16>
    %cst_25 = arith.constant dense<0.000000e+00> : vector<128x32xf32>
    %42 = tpu.matmul %41, %0, %cst_25 {dimension_numbers = #tpu.dot_dimension_numbers<[1], [0], [0], [1], [0, 0, 1, 1], [], []>} : vector<128x16xbf16>, vector<16x32xbf16>, vector<128x32xf32> -> vector<128x32xf32>
    %43 = vector.broadcast %1 : vector<1x32xf32> to vector<128x32xf32>
    %44 = arith.addf %42, %43 : vector<128x32xf32>
    %cst_26 = arith.constant 0.000000e+00 : f32
    %45 = vector.broadcast %cst_26 : f32 to vector<128x32xf32>
    %46 = arith.maximumf %44, %45 : vector<128x32xf32>
    %47 = arith.truncf %46 : vector<128x32xf32> to vector<128x32xbf16>
    %cst_27 = arith.constant dense<0.000000e+00> : vector<128x64xf32>
    %48 = tpu.matmul %47, %2, %cst_27 {dimension_numbers = #tpu.dot_dimension_numbers<[1], [0], [0], [1], [0, 0, 1, 1], [], []>} : vector<128x32xbf16>, vector<32x64xbf16>, vector<128x64xf32> -> vector<128x64xf32>
    %49 = vector.broadcast %3 : vector<1x64xf32> to vector<128x64xf32>
    %50 = arith.addf %48, %49 : vector<128x64xf32>
    %cst_28 = arith.constant 0.000000e+00 : f32
    %51 = vector.broadcast %cst_28 : f32 to vector<128x64xf32>
    %52 = arith.maximumf %50, %51 : vector<128x64xf32>
    %53 = arith.truncf %52 : vector<128x64xf32> to vector<128x64xbf16>
    %cst_29 = arith.constant dense<0.000000e+00> : vector<128x32xf32>
    %54 = tpu.matmul %53, %4, %cst_29 {dimension_numbers = #tpu.dot_dimension_numbers<[1], [0], [0], [1], [0, 0, 1, 1], [], []>} : vector<128x64xbf16>, vector<64x32xbf16>, vector<128x32xf32> -> vector<128x32xf32>
    %55 = vector.broadcast %5 : vector<1x32xf32> to vector<128x32xf32>
    %56 = arith.addf %54, %55 : vector<128x32xf32>
    %cst_30 = arith.constant 0.000000e+00 : f32
    %57 = vector.broadcast %cst_30 : f32 to vector<128x32xf32>
    %58 = arith.maximumf %56, %57 : vector<128x32xf32>
    %59 = arith.truncf %58 : vector<128x32xf32> to vector<128x32xbf16>
    %cst_31 = arith.constant dense<0.000000e+00> : vector<128x128xf32>
    %60 = tpu.matmul %59, %6, %cst_31 {dimension_numbers = #tpu.dot_dimension_numbers<[1], [0], [0], [1], [0, 0, 1, 1], [], []>} : vector<128x32xbf16>, vector<32x128xbf16>, vector<128x128xf32> -> vector<128x128xf32>
    %61 = vector.broadcast %7 : vector<1x128xf32> to vector<128x128xf32>
    %62 = arith.addf %60, %61 : vector<128x128xf32>
    %63 = arith.truncf %62 : vector<128x128xf32> to vector<128x128xbf16>
    %64 = arith.index_cast %38 : i32 to index
    %c0_32 = arith.constant 0 : index
    %65 = vector.load %arg10[%64, %c0_32] : memref<256x128xbf16, #tpu.memory_space<vmem>>, vector<128x128xbf16>
    tpu.vector_store %arg10[%64, %c0_32], %63 {strides = array<i32>} : memref<256x128xbf16, #tpu.memory_space<vmem>>, vector<128x128xbf16>,
    %c2_i32 = arith.constant 2 : i32
    return
  }
  func.func @transform_0(%arg0: i32) -> (i32, i32) {
    %c0_i32 = arith.constant 0 : i32
    %c0_i32_0 = arith.constant 0 : i32
    return %arg0, %c0_i32 : i32, i32
  }
  func.func @transform_1(%arg0: i32) -> (i32, i32) {
    %c0_i32 = arith.constant 0 : i32
    %c0_i32_0 = arith.constant 0 : i32
    %c0_i32_1 = arith.constant 0 : i32
    return %c0_i32, %c0_i32_0 : i32, i32
  }
  func.func @transform_2(%arg0: i32) -> (i32, i32) {
    %c0_i32 = arith.constant 0 : i32
    %c0_i32_0 = arith.constant 0 : i32
    %c0_i32_1 = arith.constant 0 : i32
    return %c0_i32, %c0_i32_0 : i32, i32
  }
  func.func @transform_3(%arg0: i32) -> (i32, i32) {
    %c0_i32 = arith.constant 0 : i32
    %c0_i32_0 = arith.constant 0 : i32
    %c0_i32_1 = arith.constant 0 : i32
    return %c0_i32, %c0_i32_0 : i32, i32
  }
  func.func @transform_4(%arg0: i32) -> (i32, i32) {
    %c0_i32 = arith.constant 0 : i32
    %c0_i32_0 = arith.constant 0 : i32
    %c0_i32_1 = arith.constant 0 : i32
    return %c0_i32, %c0_i32_0 : i32, i32
  }
  func.func @transform_5(%arg0: i32) -> (i32, i32) {
    %c0_i32 = arith.constant 0 : i32
    %c0_i32_0 = arith.constant 0 : i32
    %c0_i32_1 = arith.constant 0 : i32
    return %c0_i32, %c0_i32_0 : i32, i32
  }
  func.func @transform_6(%arg0: i32) -> (i32, i32) {
    %c0_i32 = arith.constant 0 : i32
    %c0_i32_0 = arith.constant 0 : i32
    %c0_i32_1 = arith.constant 0 : i32
    return %c0_i32, %c0_i32_0 : i32, i32
  }
  func.func @transform_7(%arg0: i32) -> (i32, i32) {
    %c0_i32 = arith.constant 0 : i32
    %c0_i32_0 = arith.constant 0 : i32
    %c0_i32_1 = arith.constant 0 : i32
    return %c0_i32, %c0_i32_0 : i32, i32
  }
  func.func @transform_8(%arg0: i32) -> (i32, i32) {
    %c0_i32 = arith.constant 0 : i32
    %c0_i32_0 = arith.constant 0 : i32
    %c0_i32_1 = arith.constant 0 : i32
    return %c0_i32, %c0_i32_0 : i32, i32
  }
  func.func @transform_9(%arg0: i32) -> (i32, i32) {
    %c0_i32 = arith.constant 0 : i32
    %c0_i32_0 = arith.constant 0 : i32
    return %arg0, %c0_i32 : i32, i32
  }
}

</mosaic_0001>

<bundles_post_ra>
// kernel: policy_forward.1
= control target key start
LH: loop header
LB: loop body
LE: loop exit
PB: predicated region body
PF: predicated region fallthrough
CT: control target
= control target key end

     0   :  { %s2418_s30 = smov 0   ;;  %s2784_s0 = inlined_call_operand.vmem [shape: f32[512,16], index: 0, kind: input, shape index: {}]   ;;  %s2785_s1 = inlined_call_operand.vmem [shape: bf16[16,32], index: 1, kind: input, shape index: {}]   ;;  %s2786_s2 = inlined_call_operand.vmem [shape: f32[1,32], index: 2, kind: input, shape index: {}]   ;;  %s2787_s3 = inlined_call_operand.vmem [shape: bf16[32,64], index: 3, kind: input, shape index: {}]   ;;  %s2788_s4 = inlined_call_operand.vmem [shape: f32[1,64], index: 4, kind: input, shape index: {}]   ;;  %s2789_s5 = inlined_call_operand.vmem [shape: bf16[64,32], index: 5, kind: input, shape index: {}]   ;;  %s2790_s6 = inlined_call_operand.vmem [shape: f32[1,32], index: 6, kind: input, shape index: {}]   ;;  %s2791_s7 = inlined_call_operand.vmem [shape: bf16[32,128], index: 7, kind: input, shape index: {}]   ;;  %s2792_s8 = inlined_call_operand.vmem [shape: f32[1,128], index: 8, kind: input, shape index: {}]   ;;  %s2793_s9 = inlined_call_operand.vmem [shape: bf16[512,128], index: 9, kind: output, shape index: {}]  }
   0x1 LB: > { %s1818_s10 = sadd.s32 4294967295, %s2366_s30   ;;  %p1822_p0 = scmp.ge.s32.totalorder %s2366_s30, 1  ;;  %s2366_s30 = sphi %s2418_s30, %s19_s30  }
   0x2   : > { %p288_p1 = scmp.lt.s32.totalorder %s2366_s30, 3 }
   0x4   : > { %p289_p2 = pnand %p1822_p0, %p288_p1 }
   0x5   : > { %v2429_v0 = vld [vmem:[%s2785_s1] sm:$0xff] (!%p289_p2)   ;;  %s1823_s13 = sshll.u32 (!%p289_p2), %s1818_s10, 5  ;;  %vm395_vm0 = vcmask (!%p289_p2), 130048   ;;  %v2475_v26 = vld [vmem:[%s2787_s3 + $0x8] sm:$0xff] (!%p289_p2)   ;;  %v2495_v29 = vld [vmem:[%s2789_s5 + $0x10] sm:$0xff] (!%p289_p2)   ;;  %vm559_vm1 = vcmask (!%p289_p2), 261120  }
   0x6   : > { %292 = sbr.rel (%p289_p2) target bundleno = 1406 (0x57e), region = 56  ;;  %p325_p3 = scmp.lt.s32.totalorder (!%p289_p2), %s1823_s13, 63  ;;  %2179 = vmatprep.subr.bf16.mxu0 (!%p289_p2), %v2429_v0  ;;  %v2468_v25 = vld [vmem:[%s2787_s3] sm:$0xff] (!%p289_p2)   ;;  %v2487_v28 = vld [vmem:[%s2789_s5 + $0x8] sm:$0xff] (!%p289_p2)   ;;  %vm735_vm2 = vcmask (!%p289_p2), 523264  }
   0x7   : > { %2180 = vmatpush3.bf16.msra.mxu0 (!%p289_p2), %v2429_v0  ;;  %2197 = vmatprep.subr.bf16.mxu1 (!%p289_p2), %v2468_v25  ;;  %v2482_v27 = vld [vmem:[%s2789_s5] sm:$0xff] (!%p289_p2)  }
   0x8   : > { %2198 = vmatpush3.bf16.msra.mxu1 (!%p289_p2), %v2468_v25  ;;  %2217 = vmatprep.subr.bf16.mxu0 (!%p289_p2), %v2482_v27  ;;  %v2503_v30 = vld [vmem:[%s2786_s2] ss:$0 sm:$0xff] (!%p289_p2) }
   0x9   : > { %2199 = vmatprep.subr.bf16.mxu1 (!%p289_p2), %v2475_v26 }
   0xc   : > { %2200 = vmatpush3.bf16.msra.mxu1 (!%p289_p2), %v2475_v26 }
   0xd   : > { %s2795_s13 = smov (!%p325_p3, %s1823_s13), 63 }
   0xe   : > { %s1824_s14 = sshll.u32 %s2795_s13, 3  ;;  %s1826_s23 = sshll.u32 %s2795_s13, 2 }
   0xf   : > { %s2439_s17 = scalar_lea.vmem %s2784_s0, %s1824_s14  ;;  %s2686_s26 = scalar_lea.vmem %s2793_s9, %s1826_s23 }
  0x10   : > { %v359_v1 = vld [vmem:[%s2439_s17] sm:$0xff]  ;;  %v360_v2 = vld [vmem:[%s2439_s17 + $0x8] sm:$0xff]  ;;  %v361_v3 = vld [vmem:[%s2439_s17 + $0x10] sm:$0xff] }
  0x11   : > { %v375_v4 = vpack.c.bf16 %v360_v2, %v359_v1  ;;  %v362_v5 = vld [vmem:[%s2439_s17 + $0x18] sm:$0xff]  ;;  %v363_v6 = vld [vmem:[%s2439_s17 + $0x20] sm:$0xff]  ;;  %v364_v7 = vld [vmem:[%s2439_s17 + $0x28] sm:$0xff] }
  0x12   : > { %v376_v8 = vpack.c.bf16 %v362_v5, %v361_v3  ;;  %v377_v9 = vpack.c.bf16 %v364_v7, %v363_v6  ;;  %v365_v10 = vld [vmem:[%s2439_s17 + $0x30] sm:$0xff]  ;;  %v366_v11 = vld [vmem:[%s2439_s17 + $0x38] sm:$0xff]  ;;  %v367_v12 = vld [vmem:[%s2439_s17 + $0x40] sm:$0xff] }
  0x13   : > { %2181 = vmatprep.mubr.msk.bf16.mxu0 %vm395_vm0, %v375_v4  ;;  %v368_v13 = vld [vmem:[%s2439_s17 + $0x48] sm:$0xff]  ;;  %v378_v14 = vpack.c.bf16 %v366_v11, %v365_v10  ;;  %v369_v16 = vld [vmem:[%s2439_s17 + $0x50] sm:$0xff]  ;;  %v370_v17 = vld [vmem:[%s2439_s17 + $0x58] sm:$0xff] }
  0x14   : > { %2182 = vmatmul.mubr.msk.bf16.vlgmr.msra.gmra.mrb[0].mxu0 %vm395_vm0, %v376_v8  ;;  %v379_v15 = vpack.c.bf16 %v368_v13, %v367_v12  ;;  %v371_v18 = vld [vmem:[%s2439_s17 + $0x60] sm:$0xff]  ;;  %v372_v19 = vld [vmem:[%s2439_s17 + $0x68] sm:$0xff]  ;;  %v380_v20 = vpack.c.bf16 %v370_v17, %v369_v16  ;;  %v373_v22 = vld [vmem:[%s2439_s17 + $0x70] sm:$0xff] }
  0x15   : > { %2185 = vmatprep.mubr.msk.bf16.mxu0 %vm395_vm0, %v377_v9  ;;  %v381_v21 = vpack.c.bf16 %v372_v19, %v371_v18  ;;  %v374_v23 = vld [vmem:[%s2439_s17 + $0x78] sm:$0xff]  ;;  %2218 = vmatpush3.bf16.msra.mxu0 %v2482_v27 }
  0x16   : > { %v382_v24 = vpack.c.bf16 %v374_v23, %v373_v22  ;;  %2219 = vmatprep.subr.bf16.mxu0 %v2487_v28 }
  0x19   : > { %2220 = vmatpush3.bf16.msra.mxu0 %v2487_v28 }
  0x1a   : > { %2221 = vmatprep.subr.bf16.mxu0 %v2495_v29 }
  0x1c   : > { %2186 = vmatmul.mubr.msk.bf16.gmra.mrb[4].mxu0 %vm395_vm0, %v378_v14 }
  0x1d   : > { %2189 = vmatprep.mubr.msk.bf16.mxu0 %vm395_vm0, %v379_v15  ;;  %2222 = vmatpush3.bf16.msra.mxu0 %v2495_v29 }
  0x24   : > { %2190 = vmatmul.mubr.msk.bf16.gmra.mrb[8].mxu0 %vm395_vm0, %v380_v20 }
  0x25   : > { %2193 = vmatprep.mubr.msk.bf16.mxu0 %vm395_vm0, %v381_v21 }
  0x2c   : > { %2194 = vmatmul.mubr.msk.bf16.gmra.mrb[12].mxu0 %vm395_vm0, %v382_v24  ;;  %v2532_v24 = vld [vmem:[%s2789_s5 + $0x18] sm:$0xff]  }
  0x2d   : > { %2223 = vmatprep.subr.bf16.mxu0 %v2532_v24 }
  0x2e   : > { %2224 = vmatpush3.bf16.msra.mxu0 %v2532_v24 }
  0x2f   : > { %2261 = vmatprep.subr.bf16.mxu0 %v2429_v0 }
  0xe7   : > { %v2183_v31 = vpop.f32.mrb[0].mxu0 }
  0xe8   : > { %v463_v32 = vadd.f32 %v2183_v31, %v2503_v30  ;;  %v454_v33 = vpop.f32.mrb[1].mxu0  ;;  %v2540_v31 = vld [vmem:[%s2791_s7] sm:$0xff]  }
  0xe9   : > { %v455_v34 = vadd.f32 %v2503_v30, %v454_v33  ;;  %v2184_v35 = vpop.f32.mrb[2].mxu0  ;;  %2241 = vmatprep.subr.bf16.mxu1 %v2540_v31  ;;  %v2555_v33 = vld [vmem:[%s2788_s4] ss:$0 sm:$0xff] }
  0xea   : > { %v466_v36 = vadd.f32 %v2184_v35, %v2503_v30  ;;  %v457_v37 = vpop.f32.mrb[3].mxu0  ;;  %v519_v39 = vmax.f32 %v463_v32, 0.0  ;;  %v2545_v32 = vld [vmem:[%s2791_s7 + $0x8] sm:$0xff]  }
  0xeb   : > { %v458_v38 = vadd.f32 %v2503_v30, %v457_v37  ;;  %v517_v41 = vmax.f32 %v455_v34, 0.0 }
  0xec   : > { %v520_v40 = vmax.f32 %v466_v36, 0.0 }
  0xed   : > { %v518_v42 = vmax.f32 %v458_v38, 0.0 }
  0xee   : > { %v534_v43 = vpack.c.bf16 %v520_v40, %v519_v39 }
  0xef   : > { %v2187_v44 = vpop.f32.mrb[4].mxu0  ;;  %v533_v45 = vpack.c.bf16 %v518_v42, %v517_v41 }
  0xf0   : > { %v479_v46 = vadd.f32 %v2187_v44, %v2503_v30  ;;  %v470_v47 = vpop.f32.mrb[5].mxu0 }
  0xf1   : > { %v471_v48 = vadd.f32 %v2503_v30, %v470_v47  ;;  %v2188_v49 = vpop.f32.mrb[6].mxu0  ;;  %2201 = vmatprep.mubr.msk.bf16.mxu1 %vm559_vm1, %v533_v45 }
  0xf2   : > { %v482_v50 = vadd.f32 %v2188_v49, %v2503_v30  ;;  %v473_v51 = vpop.f32.mrb[7].mxu0  ;;  %2202 = vmatmul.mubr.msk.bf16.vlgmr.msra.gmra.mrb[0].mxu1 %vm559_vm1, %v534_v43  ;;  %v523_v53 = vmax.f32 %v479_v46, 0.0 }
  0xf3   : > { %v474_v52 = vadd.f32 %v2503_v30, %v473_v51  ;;  %v521_v55 = vmax.f32 %v471_v48, 0.0  ;;  %2242 = vmatpush3.bf16.msra.mxu1 %v2540_v31 }
  0xf4   : > { %v524_v54 = vmax.f32 %v482_v50, 0.0  ;;  %2243 = vmatprep.subr.bf16.mxu1 %v2545_v32 }
  0xf5   : > { %v522_v56 = vmax.f32 %v474_v52, 0.0 }
  0xf6   : > { %v536_v57 = vpack.c.bf16 %v524_v54, %v523_v53 }
  0xf7   : > { %v535_v58 = vpack.c.bf16 %v522_v56, %v521_v55  ;;  %v2191_v59 = vpop.f32.mrb[8].mxu0  ;;  %2244 = vmatpush3.bf16.msra.mxu1 %v2545_v32 }
  0xf8   : > { %v495_v60 = vadd.f32 %v2191_v59, %v2503_v30  ;;  %v486_v61 = vpop.f32.mrb[9].mxu0  ;;  %2279 = vmatprep.subr.bf16.mxu1 %v2468_v25 }
  0xf9   : > { %v487_v62 = vadd.f32 %v2503_v30, %v486_v61  ;;  %v2192_v63 = vpop.f32.mrb[10].mxu0  ;;  %2205 = vmatprep.mubr.msk.bf16.mxu1 %vm559_vm1, %v535_v58 }
  0xfa   : > { %v498_v1 = vadd.f32 %v2192_v63, %v2503_v30  ;;  %v489_v2 = vpop.f32.mrb[11].mxu0  ;;  %2206 = vmatmul.mubr.msk.bf16.gmra.mrb[4].mxu1 %vm559_vm1, %v536_v57  ;;  %v527_v4 = vmax.f32 %v495_v60, 0.0 }
  0xfb   : > { %v490_v3 = vadd.f32 %v2503_v30, %v489_v2  ;;  %v525_v6 = vmax.f32 %v487_v62, 0.0 }
  0xfc   : > { %v528_v5 = vmax.f32 %v498_v1, 0.0 }
  0xfd   : > { %v526_v7 = vmax.f32 %v490_v3, 0.0 }
  0xfe   : > { %v538_v8 = vpack.c.bf16 %v528_v5, %v527_v4 }
  0xff   : > { %v537_v9 = vpack.c.bf16 %v526_v7, %v525_v6  ;;  %v2195_v10 = vpop.f32.mrb[12].mxu0 }
 0x100   : > { %v511_v11 = vadd.f32 %v2195_v10, %v2503_v30  ;;  %v502_v12 = vpop.f32.mrb[13].mxu0 }
 0x101   : > { %v503_v13 = vadd.f32 %v2503_v30, %v502_v12  ;;  %v2196_v14 = vpop.f32.mrb[14].mxu0  ;;  %2209 = vmatprep.mubr.msk.bf16.mxu1 %vm559_vm1, %v537_v9 }
 0x102   : > { %v514_v15 = vadd.f32 %v2196_v14, %v2503_v30  ;;  %v505_v16 = vpop.f32.mrb[15].mxu0  ;;  %2210 = vmatmul.mubr.msk.bf16.gmra.mrb[8].mxu1 %vm559_vm1, %v538_v8  ;;  %v531_v18 = vmax.f32 %v511_v11, 0.0 }
 0x103   : > { %v506_v17 = vadd.f32 %v2503_v30, %v505_v16  ;;  %v529_v20 = vmax.f32 %v503_v13, 0.0 }
 0x104   : > { %v532_v19 = vmax.f32 %v514_v15, 0.0 }
 0x105   : > { %v530_v21 = vmax.f32 %v506_v17, 0.0 }
 0x106   : > { %v540_v22 = vpack.c.bf16 %v532_v19, %v531_v18 }
 0x107   : > { %v539_v23 = vpack.c.bf16 %v530_v21, %v529_v20 }
 0x109   : > { %2213 = vmatprep.mubr.msk.bf16.mxu1 %vm559_vm1, %v539_v23  ;;  %v1889_v23 = vld [vmem:[%s2439_s17 + $0x88] sm:$0xff] }
 0x10a   : > { %2214 = vmatmul.mubr.msk.bf16.gmra.mrb[12].mxu1 %vm559_vm1, %v540_v22  ;;  %v1888_v22 = vld [vmem:[%s2439_s17 + $0x80] sm:$0xff] }
 0x1c5   : > { %v2203_v34 = vpop.f32.mrb[0].mxu1 }
 0x1c6   : > { %v627_v35 = vadd.f32 %v2203_v34, %v2555_v33  ;;  %v618_v36 = vpop.f32.mrb[1].mxu1 }
 0x1c7   : > { %v619_v37 = vadd.f32 %v2555_v33, %v618_v36  ;;  %v2204_v38 = vpop.f32.mrb[2].mxu1 }
 0x1c8   : > { %v630_v39 = vadd.f32 %v2204_v38, %v2555_v33  ;;  %v621_v40 = vpop.f32.mrb[3].mxu1  ;;  %v683_v42 = vmax.f32 %v627_v35, 0.0  ;;  %v1117_v38 = vpack.c.bf16 %v1889_v23, %v1888_v22 }
 0x1c9   : > { %v622_v41 = vadd.f32 %v2555_v33, %v621_v40  ;;  %v681_v44 = vmax.f32 %v619_v37, 0.0  ;;  %v1891_v40 = vld [vmem:[%s2439_s17 + $0x98] sm:$0xff] }
 0x1ca   : > { %v684_v43 = vmax.f32 %v630_v39, 0.0  ;;  %v1890_v39 = vld [vmem:[%s2439_s17 + $0x90] sm:$0xff] }
 0x1cb   : > { %v682_v45 = vmax.f32 %v622_v41, 0.0  ;;  %v1892_v41 = vld [vmem:[%s2439_s17 + $0xa0] sm:$0xff] }
 0x1cc   : > { %v698_v46 = vpack.c.bf16 %v684_v43, %v683_v42  ;;  %v1893_v42 = vld [vmem:[%s2439_s17 + $0xa8] sm:$0xff]  ;;  %v1118_v43 = vpack.c.bf16 %v1891_v40, %v1890_v39 }
 0x1cd   : > { %v697_v47 = vpack.c.bf16 %v682_v45, %v681_v44  ;;  %v2207_v48 = vpop.f32.mrb[4].mxu1  ;;  %v1119_v44 = vpack.c.bf16 %v1893_v42, %v1892_v41  ;;  %v1894_v45 = vld [vmem:[%s2439_s17 + $0xb0] sm:$0xff] }
 0x1ce   : > { %v643_v49 = vadd.f32 %v2207_v48, %v2555_v33  ;;  %v634_v50 = vpop.f32.mrb[5].mxu1  ;;  %v1897_v48 = vld [vmem:[%s2439_s17 + $0xc8] sm:$0xff] }
 0x1cf   : > { %v635_v51 = vadd.f32 %v2555_v33, %v634_v50  ;;  %v2208_v52 = vpop.f32.mrb[6].mxu1  ;;  %2225 = vmatprep.mubr.msk.bf16.mxu0 %vm735_vm2, %v697_v47  ;;  %v1896_v47 = vld [vmem:[%s2439_s17 + $0xc0] sm:$0xff] }
 0x1d0   : > { %v646_v53 = vadd.f32 %v2208_v52, %v2555_v33  ;;  %v637_v54 = vpop.f32.mrb[7].mxu1  ;;  %2226 = vmatmul.mubr.msk.bf16.vlgmr.msra.gmra.mrb[16].mxu0 %vm735_vm2, %v698_v46  ;;  %v687_v56 = vmax.f32 %v643_v49, 0.0  ;;  %v1895_v46 = vld [vmem:[%s2439_s17 + $0xb8] sm:$0xff]  ;;  %v1121_v50 = vpack.c.bf16 %v1897_v48, %v1896_v47 }
 0x1d1   : > { %v638_v55 = vadd.f32 %v2555_v33, %v637_v54  ;;  %2262 = vmatpush3.bf16.msra.mxu0 %v2429_v0  ;;  %v685_v58 = vmax.f32 %v635_v51, 0.0  ;;  %v1120_v49 = vpack.c.bf16 %v1895_v46, %v1894_v45  ;;  %v1898_v51 = vld [vmem:[%s2439_s17 + $0xd0] sm:$0xff]  ;;  %v1899_v52 = vld [vmem:[%s2439_s17 + $0xd8] sm:$0xff] }
 0x1d2   : > { %v688_v57 = vmax.f32 %v646_v53, 0.0  ;;  %2299 = vmatprep.subr.bf16.mxu0 %v2482_v27  ;;  %v1901_v53 = vld [vmem:[%s2439_s17 + $0xe8] sm:$0xff]  ;;  %v1122_v54 = vpack.c.bf16 %v1899_v52, %v1898_v51 }
 0x1d3   : > { %v686_v59 = vmax.f32 %v638_v55, 0.0 }
 0x1d4   : > { %v700_v60 = vpack.c.bf16 %v688_v57, %v687_v56  ;;  %v1903_v56 = vld [vmem:[%s2439_s17 + $0xf8] sm:$0xff] }
 0x1d5   : > { %v699_v61 = vpack.c.bf16 %v686_v59, %v685_v58  ;;  %v2211_v62 = vpop.f32.mrb[8].mxu1 }
 0x1d6   : > { %v659_v63 = vadd.f32 %v2211_v62, %v2555_v33  ;;  %v650_v1 = vpop.f32.mrb[9].mxu1 }
 0x1d7   : > { %v651_v2 = vadd.f32 %v2555_v33, %v650_v1  ;;  %v2212_v3 = vpop.f32.mrb[10].mxu1  ;;  %2229 = vmatprep.mubr.msk.bf16.mxu0 %vm735_vm2, %v699_v61 }
 0x1d8   : > { %v662_v4 = vadd.f32 %v2212_v3, %v2555_v33  ;;  %v653_v0 = vpop.f32.mrb[11].mxu1  ;;  %2230 = vmatmul.mubr.msk.bf16.gmra.mrb[20].mxu0 %vm735_vm2, %v700_v60  ;;  %v691_v6 = vmax.f32 %v659_v63, 0.0 }
 0x1d9   : > { %v654_v5 = vadd.f32 %v2555_v33, %v653_v0  ;;  %v689_v8 = vmax.f32 %v651_v2, 0.0 }
 0x1da   : > { %v692_v7 = vmax.f32 %v662_v4, 0.0 }
 0x1db   : > { %v690_v9 = vmax.f32 %v654_v5, 0.0 }
 0x1dc   : > { %v702_v10 = vpack.c.bf16 %v692_v7, %v691_v6 }
 0x1dd   : > { %v701_v11 = vpack.c.bf16 %v690_v9, %v689_v8  ;;  %v2215_v12 = vpop.f32.mrb[12].mxu1 }
 0x1de   : > { %v675_v13 = vadd.f32 %v2215_v12, %v2555_v33  ;;  %v666_v14 = vpop.f32.mrb[13].mxu1 }
 0x1df   : > { %v667_v15 = vadd.f32 %v2555_v33, %v666_v14  ;;  %v2216_v16 = vpop.f32.mrb[14].mxu1  ;;  %2233 = vmatprep.mubr.msk.bf16.mxu0 %vm735_vm2, %v701_v11 }
 0x1e0   : > { %v678_v17 = vadd.f32 %v2216_v16, %v2555_v33  ;;  %v669_v18 = vpop.f32.mrb[15].mxu1  ;;  %2234 = vmatmul.mubr.msk.bf16.gmra.mrb[24].mxu0 %vm735_vm2, %v702_v10  ;;  %v695_v20 = vmax.f32 %v675_v13, 0.0 }
 0x1e1   : > { %v670_v19 = vadd.f32 %v2555_v33, %v669_v18  ;;  %v693_v34 = vmax.f32 %v667_v15, 0.0 }
 0x1e2   : > { %v696_v21 = vmax.f32 %v678_v17, 0.0 }
 0x1e3   : > { %v694_v35 = vmax.f32 %v670_v19, 0.0 }
 0x1e4   : > { %v704_v36 = vpack.c.bf16 %v696_v21, %v695_v20 }
 0x1e5   : > { %v703_v37 = vpack.c.bf16 %v694_v35, %v693_v34 }
 0x1e7   : > { %2237 = vmatprep.mubr.msk.bf16.mxu0 %vm735_vm2, %v703_v37 }
 0x1e8   : > { %2238 = vmatmul.mubr.msk.bf16.gmra.mrb[28].mxu0 %vm735_vm2, %v704_v36 }
 0x1e9   : > { %2263 = vmatprep.mubr.msk.bf16.mxu0 %vm395_vm0, %v1117_v38 }
 0x1f0   : > { %2264 = vmatmul.mubr.msk.bf16.vlgmr.msra.gmra.mrb[32].mxu0 %vm395_vm0, %v1118_v43 }
 0x1f1   : > { %2267 = vmatprep.mubr.msk.bf16.mxu0 %vm395_vm0, %v1119_v44  ;;  %2300 = vmatpush3.bf16.msra.mxu0 %v2482_v27  ;;  %v1900_v27 = vld [vmem:[%s2439_s17 + $0xe0] sm:$0xff] }
 0x1f2   : > { %2301 = vmatprep.subr.bf16.mxu0 %v2487_v28  ;;  %v1123_v55 = vpack.c.bf16 %v1901_v53, %v1900_v27 }
 0x1f5   : > { %2302 = vmatpush3.bf16.msra.mxu0 %v2487_v28  ;;  %v1902_v28 = vld [vmem:[%s2439_s17 + $0xf0] sm:$0xff] }
 0x1f6   : > { %2303 = vmatprep.subr.bf16.mxu0 %v2495_v29  ;;  %v1124_v57 = vpack.c.bf16 %v1903_v56, %v1902_v28 }
 0x1f8   : > { %2268 = vmatmul.mubr.msk.bf16.gmra.mrb[36].mxu0 %vm395_vm0, %v1120_v49 }
 0x1f9   : > { %2271 = vmatprep.mubr.msk.bf16.mxu0 %vm395_vm0, %v1121_v50  ;;  %2304 = vmatpush3.bf16.msra.mxu0 %v2495_v29  ;;  %v2617_v29 = vld [vmem:[%s2790_s6] ss:$0 sm:$0xff] }
 0x1fa   : > { %2305 = vmatprep.subr.bf16.mxu0 %v2532_v24 }
 0x1fd   : > { %2306 = vmatpush3.bf16.msra.mxu0 %v2532_v24 }
 0x200   : > { %2272 = vmatmul.mubr.msk.bf16.gmra.mrb[40].mxu0 %vm395_vm0, %v1122_v54 }
 0x201   : > { %2275 = vmatprep.mubr.msk.bf16.mxu0 %vm395_vm0, %v1123_v55 }
 0x208   : > { %2276 = vmatmul.mubr.msk.bf16.gmra.mrb[44].mxu0 %vm395_vm0, %v1124_v57 }
 0x2a3   : > { %v2227_v58 = vpop.f32.mrb[16].mxu0 }
 0x2a4   : > { %v803_v59 = vadd.f32 %v2227_v58, %v2617_v29  ;;  %v794_v60 = vpop.f32.mrb[17].mxu0 }
 0x2a5   : > { %v795_v24 = vadd.f32 %v2617_v29, %v794_v60  ;;  %v2228_v61 = vpop.f32.mrb[18].mxu0 }
 0x2a6   : > { %v806_v62 = vadd.f32 %v2228_v61, %v2617_v29  ;;  %v797_v63 = vpop.f32.mrb[19].mxu0  ;;  %v859_v2 = vmax.f32 %v803_v59, 0.0 }
 0x2a7   : > { %v798_v1 = vadd.f32 %v2617_v29, %v797_v63  ;;  %v857_v4 = vmax.f32 %v795_v24, 0.0 }
 0x2a8   : > { %v860_v3 = vmax.f32 %v806_v62, 0.0 }
 0x2a9   : > { %v858_v0 = vmax.f32 %v798_v1, 0.0 }
 0x2aa   : > { %v874_v5 = vpack.c.bf16 %v860_v3, %v859_v2 }
 0x2ab   : > { %v873_v6 = vpack.c.bf16 %v858_v0, %v857_v4  ;;  %v2231_v7 = vpop.f32.mrb[20].mxu0 }
 0x2ac   : > { %v819_v8 = vadd.f32 %v2231_v7, %v2617_v29  ;;  %v810_v9 = vpop.f32.mrb[21].mxu0 }
 0x2ad   : > { %v811_v10 = vadd.f32 %v2617_v29, %v810_v9  ;;  %v2232_v11 = vpop.f32.mrb[22].mxu0  ;;  %2245 = vmatprep.mubr.msk.bf16.mxu1 %vm559_vm1, %v873_v6 }
 0x2ae   : > { %v822_v12 = vadd.f32 %v2232_v11, %v2617_v29  ;;  %v813_v13 = vpop.f32.mrb[23].mxu0  ;;  %2246 = vmatmul.mubr.msk.bf16.vlgmr.msra.gmra.mrb[16].mxu1 %vm559_vm1, %v874_v5  ;;  %v863_v15 = vmax.f32 %v819_v8, 0.0 }
 0x2af   : > { %v814_v14 = vadd.f32 %v2617_v29, %v813_v13  ;;  %2280 = vmatpush3.bf16.msra.mxu1 %v2468_v25  ;;  %v861_v17 = vmax.f32 %v811_v10, 0.0 }
 0x2b0   : > { %v864_v16 = vmax.f32 %v822_v12, 0.0  ;;  %2281 = vmatprep.subr.bf16.mxu1 %v2475_v26 }
 0x2b1   : > { %v862_v18 = vmax.f32 %v814_v14, 0.0 }
 0x2b2   : > { %v876_v19 = vpack.c.bf16 %v864_v16, %v863_v15 }
 0x2b3   : > { %v875_v20 = vpack.c.bf16 %v862_v18, %v861_v17  ;;  %v2235_v21 = vpop.f32.mrb[24].mxu0  ;;  %2282 = vmatpush3.bf16.msra.mxu1 %v2475_v26 }
 0x2b4   : > { %v835_v22 = vadd.f32 %v2235_v21, %v2617_v29  ;;  %v826_v23 = vpop.f32.mrb[25].mxu0  ;;  %2323 = vmatprep.subr.bf16.mxu1 %v2540_v31 }
 0x2b5   : > { %v827_v34 = vadd.f32 %v2617_v29, %v826_v23  ;;  %v2236_v35 = vpop.f32.mrb[26].mxu0  ;;  %2249 = vmatprep.mubr.msk.bf16.mxu1 %vm559_vm1, %v875_v20 }
 0x2b6   : > { %v838_v25 = vadd.f32 %v2236_v35, %v2617_v29  ;;  %v829_v36 = vpop.f32.mrb[27].mxu0  ;;  %2250 = vmatmul.mubr.msk.bf16.gmra.mrb[20].mxu1 %vm559_vm1, %v876_v19  ;;  %v867_v38 = vmax.f32 %v835_v22, 0.0 }
 0x2b7   : > { %v830_v37 = vadd.f32 %v2617_v29, %v829_v36  ;;  %v865_v26 = vmax.f32 %v827_v34, 0.0 }
 0x2b8   : > { %v868_v39 = vmax.f32 %v838_v25, 0.0 }
 0x2b9   : > { %v866_v40 = vmax.f32 %v830_v37, 0.0 }
 0x2ba   : > { %v878_v41 = vpack.c.bf16 %v868_v39, %v867_v38 }
 0x2bb   : > { %v877_v42 = vpack.c.bf16 %v866_v40, %v865_v26  ;;  %v2239_v43 = vpop.f32.mrb[28].mxu0 }
 0x2bc   : > { %v851_v44 = vadd.f32 %v2239_v43, %v2617_v29  ;;  %v842_v45 = vpop.f32.mrb[29].mxu0 }
 0x2bd   : > { %v843_v46 = vadd.f32 %v2617_v29, %v842_v45  ;;  %v2240_v47 = vpop.f32.mrb[30].mxu0  ;;  %2253 = vmatprep.mubr.msk.bf16.mxu1 %vm559_vm1, %v877_v42 }
 0x2be   : > { %v854_v48 = vadd.f32 %v2240_v47, %v2617_v29  ;;  %v845_v49 = vpop.f32.mrb[31].mxu0  ;;  %2254 = vmatmul.mubr.msk.bf16.gmra.mrb[24].mxu1 %vm559_vm1, %v878_v41  ;;  %v871_v51 = vmax.f32 %v851_v44, 0.0 }
 0x2bf   : > { %v846_v50 = vadd.f32 %v2617_v29, %v845_v49  ;;  %v869_v27 = vmax.f32 %v843_v46, 0.0 }
 0x2c0   : > { %v872_v52 = vmax.f32 %v854_v48, 0.0 }
 0x2c1   : > { %v870_v53 = vmax.f32 %v846_v50, 0.0 }
 0x2c2   : > { %v880_v54 = vpack.c.bf16 %v872_v52, %v871_v51 }
 0x2c3   : > { %v879_v55 = vpack.c.bf16 %v870_v53, %v869_v27  ;;  %v2265_v28 = vpop.f32.mrb[32].mxu0  ;;  %v2677_v27 = vld [vmem:[%s2792_s8] ss:$0 sm:$0xff] }
 0x2c4   : > { %v1192_v56 = vadd.f32 %v2265_v28, %v2503_v30  ;;  %v1183_v57 = vpop.f32.mrb[33].mxu0 }
 0x2c5   : > { %v1184_v58 = vadd.f32 %v2503_v30, %v1183_v57  ;;  %2257 = vmatprep.mubr.msk.bf16.mxu1 %vm559_vm1, %v879_v55  ;;  %v2266_v59 = vpop.f32.mrb[34].mxu0 }
 0x2c6   : > { %v1195_v60 = vadd.f32 %v2266_v59, %v2503_v30  ;;  %2258 = vmatmul.mubr.msk.bf16.gmra.mrb[28].mxu1 %vm559_vm1, %v880_v54  ;;  %v1186_v24 = vpop.f32.mrb[35].mxu0  ;;  %v1248_v62 = vmax.f32 %v1192_v56, 0.0 }
 0x2c7   : > { %v1187_v61 = vadd.f32 %v2503_v30, %v1186_v24  ;;  %v1246_v1 = vmax.f32 %v1184_v58, 0.0 }
 0x2c8   : > { %v1249_v63 = vmax.f32 %v1195_v60, 0.0 }
 0x2c9   : > { %v1247_v2 = vmax.f32 %v1187_v61, 0.0 }
 0x2ca   : > { %v1263_v3 = vpack.c.bf16 %v1249_v63, %v1248_v62 }
 0x2cb   : > { %v1262_v4 = vpack.c.bf16 %v1247_v2, %v1246_v1  ;;  %v2269_v0 = vpop.f32.mrb[36].mxu0 }
 0x2cc   : > { %v1208_v5 = vadd.f32 %v2269_v0, %v2503_v30  ;;  %v1199_v6 = vpop.f32.mrb[37].mxu0 }
 0x2cd   : > { %v1200_v7 = vadd.f32 %v2503_v30, %v1199_v6  ;;  %v2270_v8 = vpop.f32.mrb[38].mxu0  ;;  %2283 = vmatprep.mubr.msk.bf16.mxu1 %vm559_vm1, %v1262_v4 }
 0x2ce   : > { %v1211_v9 = vadd.f32 %v2270_v8, %v2503_v30  ;;  %v1202_v10 = vpop.f32.mrb[39].mxu0  ;;  %2284 = vmatmul.mubr.msk.bf16.vlgmr.msra.gmra.mrb[32].mxu1 %vm559_vm1, %v1263_v3  ;;  %v1252_v12 = vmax.f32 %v1208_v5, 0.0 }
 0x2cf   : > { %v1203_v11 = vadd.f32 %v2503_v30, %v1202_v10  ;;  %2324 = vmatpush3.bf16.msra.mxu1 %v2540_v31  ;;  %v1250_v14 = vmax.f32 %v1200_v7, 0.0 }
 0x2d0   : > { %v1253_v13 = vmax.f32 %v1211_v9, 0.0  ;;  %2325 = vmatprep.subr.bf16.mxu1 %v2545_v32 }
 0x2d1   : > { %v1251_v15 = vmax.f32 %v1203_v11, 0.0 }
 0x2d2   : > { %v1265_v16 = vpack.c.bf16 %v1253_v13, %v1252_v12 }
 0x2d3   : > { %v1264_v17 = vpack.c.bf16 %v1251_v15, %v1250_v14  ;;  %v2273_v18 = vpop.f32.mrb[40].mxu0  ;;  %2326 = vmatpush3.bf16.msra.mxu1 %v2545_v32 }
 0x2d4   : > { %v1224_v19 = vadd.f32 %v2273_v18, %v2503_v30  ;;  %v1215_v20 = vpop.f32.mrb[41].mxu0 }
 0x2d5   : > { %v1216_v21 = vadd.f32 %v2503_v30, %v1215_v20  ;;  %v2274_v22 = vpop.f32.mrb[42].mxu0  ;;  %2287 = vmatprep.mubr.msk.bf16.mxu1 %vm559_vm1, %v1264_v17 }
 0x2d6   : > { %v1227_v31 = vadd.f32 %v2274_v22, %v2503_v30  ;;  %v1218_v23 = vpop.f32.mrb[43].mxu0  ;;  %2288 = vmatmul.mubr.msk.bf16.gmra.mrb[36].mxu1 %vm559_vm1, %v1265_v16  ;;  %v1256_v35 = vmax.f32 %v1224_v19, 0.0 }
 0x2d7   : > { %v1219_v34 = vadd.f32 %v2503_v30, %v1218_v23  ;;  %v1254_v36 = vmax.f32 %v1216_v21, 0.0 }
 0x2d8   : > { %v1257_v25 = vmax.f32 %v1227_v31, 0.0 }
 0x2d9   : > { %v1255_v37 = vmax.f32 %v1219_v34, 0.0 }
 0x2da   : > { %v1267_v32 = vpack.c.bf16 %v1257_v25, %v1256_v35 }
 0x2db   : > { %v1266_v38 = vpack.c.bf16 %v1255_v37, %v1254_v36  ;;  %v2277_v39 = vpop.f32.mrb[44].mxu0 }
 0x2dc   : > { %v1240_v26 = vadd.f32 %v2277_v39, %v2503_v30  ;;  %v1231_v40 = vpop.f32.mrb[45].mxu0 }
 0x2dd   : > { %v1232_v41 = vadd.f32 %v2503_v30, %v1231_v40  ;;  %v2278_v42 = vpop.f32.mrb[46].mxu0  ;;  %2291 = vmatprep.mubr.msk.bf16.mxu1 %vm559_vm1, %v1266_v38 }
 0x2de   : > { %v1243_v43 = vadd.f32 %v2278_v42, %v2503_v30  ;;  %v1234_v44 = vpop.f32.mrb[47].mxu0  ;;  %2292 = vmatmul.mubr.msk.bf16.gmra.mrb[40].mxu1 %vm559_vm1, %v1267_v32  ;;  %v1260_v46 = vmax.f32 %v1240_v26, 0.0 }
 0x2df   : > { %v1235_v45 = vadd.f32 %v2503_v30, %v1234_v44  ;;  %v1258_v48 = vmax.f32 %v1232_v41, 0.0 }
 0x2e0   : > { %v1261_v47 = vmax.f32 %v1243_v43, 0.0 }
 0x2e1   : > { %v1259_v49 = vmax.f32 %v1235_v45, 0.0 }
 0x2e2   : > { %v1269_v50 = vpack.c.bf16 %v1261_v47, %v1260_v46 }
 0x2e3   : > { %v1268_v51 = vpack.c.bf16 %v1259_v49, %v1258_v48 }
 0x2e5   : > { %2295 = vmatprep.mubr.msk.bf16.mxu1 %vm559_vm1, %v1268_v51 }
 0x2e6   : > { %2296 = vmatmul.mubr.msk.bf16.gmra.mrb[44].mxu1 %vm559_vm1, %v1269_v50 }
 0x381   : > { %v2247_v52 = vpop.f32.mrb[16].mxu1 }
 0x382   : > { %v957_v53 = vpop.f32.mrb[17].mxu1  ;;  %v966_v30 = vadd.f32 %v2247_v52, %v2677_v27 }
 0x383   : > { %v2248_v54 = vpop.f32.mrb[18].mxu1  ;;  %v958_v56 = vadd.f32 %v2677_v27, %v957_v53 }
 0x384   : > { %v969_v55 = vadd.f32 %v2248_v54, %v2677_v27  ;;  %v960_v28 = vpop.f32.mrb[19].mxu1 }
 0x385   : > { %v961_v57 = vadd.f32 %v2677_v27, %v960_v28 }
 0x386   : > { %v2010_v58 = vpack.c.bf16 %v969_v55, %v966_v30 }
 0x387   : > { %v2005_v59 = vpack.c.bf16 %v961_v57, %v958_v56 }
 0x388   : > { %2082 = vst [vmem:[%s2686_s26 + $0x8] sm:$0xff] %v2010_v58  }
 0x389   : > { %2006 = vst [vmem:[%s2686_s26] sm:$0xff] %v2005_v59   ;;  %v2251_v60 = vpop.f32.mrb[20].mxu1 }
 0x38a   : > { %v973_v24 = vpop.f32.mrb[21].mxu1  ;;  %v982_v62 = vadd.f32 %v2251_v60, %v2677_v27 }
 0x38b   : > { %v2252_v61 = vpop.f32.mrb[22].mxu1  ;;  %v974_v2 = vadd.f32 %v2677_v27, %v973_v24 }
 0x38c   : > { %v985_v63 = vadd.f32 %v2252_v61, %v2677_v27  ;;  %v976_v1 = vpop.f32.mrb[23].mxu1 }
 0x38d   : > { %v977_v3 = vadd.f32 %v2677_v27, %v976_v1 }
 0x38e   : > { %v2020_v4 = vpack.c.bf16 %v985_v63, %v982_v62 }
 0x38f   : > { %v2015_v0 = vpack.c.bf16 %v977_v3, %v974_v2 }
 0x390   : > { %2084 = vst [vmem:[%s2686_s26 + $0x18] sm:$0xff] %v2020_v4  }
 0x391   : > { %2083 = vst [vmem:[%s2686_s26 + $0x10] sm:$0xff] %v2015_v0   ;;  %v2255_v5 = vpop.f32.mrb[24].mxu1 }
 0x392   : > { %v989_v6 = vpop.f32.mrb[25].mxu1  ;;  %v998_v8 = vadd.f32 %v2255_v5, %v2677_v27 }
 0x393   : > { %v2256_v7 = vpop.f32.mrb[26].mxu1  ;;  %v990_v11 = vadd.f32 %v2677_v27, %v989_v6 }
 0x394   : > { %v1001_v9 = vadd.f32 %v2256_v7, %v2677_v27  ;;  %v992_v10 = vpop.f32.mrb[27].mxu1 }
 0x395   : > { %v993_v12 = vadd.f32 %v2677_v27, %v992_v10 }
 0x396   : > { %v2030_v13 = vpack.c.bf16 %v1001_v9, %v998_v8 }
 0x397   : > { %v2025_v14 = vpack.c.bf16 %v993_v12, %v990_v11 }
 0x398   : > { %2086 = vst [vmem:[%s2686_s26 + $0x28] sm:$0xff] %v2030_v13  }
 0x399   : > { %2085 = vst [vmem:[%s2686_s26 + $0x20] sm:$0xff] %v2025_v14   ;;  %v2259_v15 = vpop.f32.mrb[28].mxu1 }
 0x39a   : > { %v1005_v16 = vpop.f32.mrb[29].mxu1  ;;  %v1014_v18 = vadd.f32 %v2259_v15, %v2677_v27 }
 0x39b   : > { %v2260_v17 = vpop.f32.mrb[30].mxu1  ;;  %v1006_v21 = vadd.f32 %v2677_v27, %v1005_v16 }
 0x39c   : > { %v1017_v19 = vadd.f32 %v2260_v17, %v2677_v27  ;;  %v1008_v20 = vpop.f32.mrb[31].mxu1 }
 0x39d   : > { %v1009_v22 = vadd.f32 %v2677_v27, %v1008_v20 }
 0x39e   : > { %v2040_v31 = vpack.c.bf16 %v1017_v19, %v1014_v18 }
 0x39f   : > { %v2035_v23 = vpack.c.bf16 %v1009_v22, %v1006_v21 }
 0x3a0   : > { %2088 = vst [vmem:[%s2686_s26 + $0x38] sm:$0xff] %v2040_v31  }
 0x3a1   : > { %2087 = vst [vmem:[%s2686_s26 + $0x30] sm:$0xff] %v2035_v23   ;;  %v2285_v34 = vpop.f32.mrb[32].mxu1 }
 0x3a2   : > { %v1337_v35 = vadd.f32 %v2285_v34, %v2555_v33  ;;  %v1328_v25 = vpop.f32.mrb[33].mxu1 }
 0x3a3   : > { %v1329_v36 = vadd.f32 %v2555_v33, %v1328_v25  ;;  %v2286_v37 = vpop.f32.mrb[34].mxu1 }
 0x3a4   : > { %v1340_v32 = vadd.f32 %v2286_v37, %v2555_v33  ;;  %v1331_v38 = vpop.f32.mrb[35].mxu1  ;;  %v1393_v26 = vmax.f32 %v1337_v35, 0.0 }
 0x3a5   : > { %v1332_v39 = vadd.f32 %v2555_v33, %v1331_v38  ;;  %v1391_v41 = vmax.f32 %v1329_v36, 0.0 }
 0x3a6   : > { %v1394_v40 = vmax.f32 %v1340_v32, 0.0 }
 0x3a7   : > { %v1392_v42 = vmax.f32 %v1332_v39, 0.0 }
 0x3a8   : > { %v1408_v43 = vpack.c.bf16 %v1394_v40, %v1393_v26 }
 0x3a9   : > { %v1407_v44 = vpack.c.bf16 %v1392_v42, %v1391_v41  ;;  %v2289_v45 = vpop.f32.mrb[36].mxu1 }
 0x3aa   : > { %v1353_v46 = vadd.f32 %v2289_v45, %v2555_v33  ;;  %v1344_v47 = vpop.f32.mrb[37].mxu1 }
 0x3ab   : > { %v1345_v48 = vadd.f32 %v2555_v33, %v1344_v47  ;;  %v2290_v49 = vpop.f32.mrb[38].mxu1  ;;  %2307 = vmatprep.mubr.msk.bf16.mxu0 %vm735_vm2, %v1407_v44 }
 0x3ac   : > { %v1356_v50 = vadd.f32 %v2290_v49, %v2555_v33  ;;  %v1347_v51 = vpop.f32.mrb[39].mxu1  ;;  %2308 = vmatmul.mubr.msk.bf16.vlgmr.msra.gmra.mrb[48].mxu0 %vm735_vm2, %v1408_v43  ;;  %v1397_v53 = vmax.f32 %v1353_v46, 0.0 }
 0x3ad   : > { %v1348_v52 = vadd.f32 %v2555_v33, %v1347_v51  ;;  %v1395_v30 = vmax.f32 %v1345_v48, 0.0 }
 0x3ae   : > { %v1398_v54 = vmax.f32 %v1356_v50, 0.0 }
 0x3af   : > { %v1396_v55 = vmax.f32 %v1348_v52, 0.0 }
 0x3b0   : > { %v1410_v28 = vpack.c.bf16 %v1398_v54, %v1397_v53 }
 0x3b1   : > { %v1409_v56 = vpack.c.bf16 %v1396_v55, %v1395_v30  ;;  %v2293_v57 = vpop.f32.mrb[40].mxu1 }
 0x3b2   : > { %v1369_v58 = vadd.f32 %v2293_v57, %v2555_v33  ;;  %v1360_v59 = vpop.f32.mrb[41].mxu1 }
 0x3b3   : > { %v1361_v60 = vadd.f32 %v2555_v33, %v1360_v59  ;;  %v2294_v24 = vpop.f32.mrb[42].mxu1  ;;  %2311 = vmatprep.mubr.msk.bf16.mxu0 %vm735_vm2, %v1409_v56 }
 0x3b4   : > { %v1372_v61 = vadd.f32 %v2294_v24, %v2555_v33  ;;  %v1363_v62 = vpop.f32.mrb[43].mxu1  ;;  %2312 = vmatmul.mubr.msk.bf16.gmra.mrb[52].mxu0 %vm735_vm2, %v1410_v28  ;;  %v1401_v1 = vmax.f32 %v1369_v58, 0.0 }
 0x3b5   : > { %v1364_v63 = vadd.f32 %v2555_v33, %v1363_v62  ;;  %v1399_v3 = vmax.f32 %v1361_v60, 0.0 }
 0x3b6   : > { %v1402_v2 = vmax.f32 %v1372_v61, 0.0 }
 0x3b7   : > { %v1400_v4 = vmax.f32 %v1364_v63, 0.0 }
 0x3b8   : > { %v1412_v0 = vpack.c.bf16 %v1402_v2, %v1401_v1 }
 0x3b9   : > { %v1411_v5 = vpack.c.bf16 %v1400_v4, %v1399_v3  ;;  %v2297_v6 = vpop.f32.mrb[44].mxu1 }
 0x3ba   : > { %v1385_v7 = vadd.f32 %v2297_v6, %v2555_v33  ;;  %v1376_v8 = vpop.f32.mrb[45].mxu1 }
 0x3bb   : > { %v1377_v9 = vadd.f32 %v2555_v33, %v1376_v8  ;;  %v2298_v10 = vpop.f32.mrb[46].mxu1  ;;  %2315 = vmatprep.mubr.msk.bf16.mxu0 %vm735_vm2, %v1411_v5 }
 0x3bc   : > { %v1388_v11 = vadd.f32 %v2298_v10, %v2555_v33  ;;  %v1379_v12 = vpop.f32.mrb[47].mxu1  ;;  %2316 = vmatmul.mubr.msk.bf16.gmra.mrb[56].mxu0 %vm735_vm2, %v1412_v0  ;;  %v1405_v14 = vmax.f32 %v1385_v7, 0.0 }
 0x3bd   : > { %v1380_v13 = vadd.f32 %v2555_v33, %v1379_v12  ;;  %v1403_v16 = vmax.f32 %v1377_v9, 0.0 }
 0x3be   : > { %v1406_v15 = vmax.f32 %v1388_v11, 0.0 }
 0x3bf   : > { %v1404_v17 = vmax.f32 %v1380_v13, 0.0 }
 0x3c0   : > { %v1414_v18 = vpack.c.bf16 %v1406_v15, %v1405_v14 }
 0x3c1   : > { %v1413_v19 = vpack.c.bf16 %v1404_v17, %v1403_v16 }
 0x3c3   : > { %2319 = vmatprep.mubr.msk.bf16.mxu0 %vm735_vm2, %v1413_v19 }
 0x3c4   : > { %2320 = vmatmul.mubr.msk.bf16.gmra.mrb[60].mxu0 %vm735_vm2, %v1414_v18 }
 0x47f   : > { %v2309_v20 = vpop.f32.mrb[48].mxu0 }
 0x480   : > { %v1482_v21 = vadd.f32 %v2309_v20, %v2617_v29  ;;  %v1473_v22 = vpop.f32.mrb[49].mxu0 }
 0x481   : > { %v1474_v31 = vadd.f32 %v2617_v29, %v1473_v22  ;;  %v2310_v23 = vpop.f32.mrb[50].mxu0 }
 0x482   : > { %v1485_v34 = vadd.f32 %v2310_v23, %v2617_v29  ;;  %v1476_v33 = vpop.f32.mrb[51].mxu0  ;;  %v1538_v25 = vmax.f32 %v1482_v21, 0.0 }
 0x483   : > { %v1477_v35 = vadd.f32 %v2617_v29, %v1476_v33  ;;  %v1536_v37 = vmax.f32 %v1474_v31, 0.0 }
 0x484   : > { %v1539_v36 = vmax.f32 %v1485_v34, 0.0 }
 0x485   : > { %v1537_v32 = vmax.f32 %v1477_v35, 0.0 }
 0x486   : > { %v1553_v38 = vpack.c.bf16 %v1539_v36, %v1538_v25 }
 0x487   : > { %v1552_v39 = vpack.c.bf16 %v1537_v32, %v1536_v37  ;;  %v2313_v26 = vpop.f32.mrb[52].mxu0 }
 0x488   : > { %v1498_v40 = vadd.f32 %v2313_v26, %v2617_v29  ;;  %v1489_v41 = vpop.f32.mrb[53].mxu0 }
 0x489   : > { %v1490_v42 = vadd.f32 %v2617_v29, %v1489_v41  ;;  %v2314_v43 = vpop.f32.mrb[54].mxu0  ;;  %2327 = vmatprep.mubr.msk.bf16.mxu1 %vm559_vm1, %v1552_v39 }
 0x48a   : > { %v1501_v44 = vadd.f32 %v2314_v43, %v2617_v29  ;;  %v1492_v45 = vpop.f32.mrb[55].mxu0  ;;  %2328 = vmatmul.mubr.msk.bf16.vlgmr.msra.gmra.mrb[48].mxu1 %vm559_vm1, %v1553_v38  ;;  %v1542_v47 = vmax.f32 %v1498_v40, 0.0 }
 0x48b   : > { %v1493_v46 = vadd.f32 %v2617_v29, %v1492_v45  ;;  %v1540_v49 = vmax.f32 %v1490_v42, 0.0 }
 0x48c   : > { %v1543_v48 = vmax.f32 %v1501_v44, 0.0 }
 0x48d   : > { %v1541_v50 = vmax.f32 %v1493_v46, 0.0 }
 0x48e   : > { %v1555_v51 = vpack.c.bf16 %v1543_v48, %v1542_v47 }
 0x48f   : > { %v1554_v52 = vpack.c.bf16 %v1541_v50, %v1540_v49  ;;  %v2317_v53 = vpop.f32.mrb[56].mxu0 }
 0x490   : > { %v1514_v54 = vadd.f32 %v2317_v53, %v2617_v29  ;;  %v1505_v30 = vpop.f32.mrb[57].mxu0 }
 0x491   : > { %v1506_v55 = vadd.f32 %v2617_v29, %v1505_v30  ;;  %v2318_v28 = vpop.f32.mrb[58].mxu0  ;;  %2331 = vmatprep.mubr.msk.bf16.mxu1 %vm559_vm1, %v1554_v52 }
 0x492   : > { %v1517_v56 = vadd.f32 %v2318_v28, %v2617_v29  ;;  %v1508_v57 = vpop.f32.mrb[59].mxu0  ;;  %2332 = vmatmul.mubr.msk.bf16.gmra.mrb[52].mxu1 %vm559_vm1, %v1555_v51  ;;  %v1546_v59 = vmax.f32 %v1514_v54, 0.0 }
 0x493   : > { %v1509_v58 = vadd.f32 %v2617_v29, %v1508_v57  ;;  %v1544_v24 = vmax.f32 %v1506_v55, 0.0 }
 0x494   : > { %v1547_v60 = vmax.f32 %v1517_v56, 0.0 }
 0x495   : > { %v1545_v61 = vmax.f32 %v1509_v58, 0.0 }
 0x496   : > { %v1557_v62 = vpack.c.bf16 %v1547_v60, %v1546_v59 }
 0x497   : > { %v1556_v63 = vpack.c.bf16 %v1545_v61, %v1544_v24  ;;  %v2321_v1 = vpop.f32.mrb[60].mxu0 }
 0x498   : > { %v1530_v2 = vadd.f32 %v2321_v1, %v2617_v29  ;;  %v1521_v3 = vpop.f32.mrb[61].mxu0 }
 0x499   : > { %v1522_v4 = vadd.f32 %v2617_v29, %v1521_v3  ;;  %v2322_v0 = vpop.f32.mrb[62].mxu0  ;;  %2335 = vmatprep.mubr.msk.bf16.mxu1 %vm559_vm1, %v1556_v63 }
 0x49a   : > { %v1533_v5 = vadd.f32 %v2322_v0, %v2617_v29  ;;  %v1524_v6 = vpop.f32.mrb[63].mxu0  ;;  %2336 = vmatmul.mubr.msk.bf16.gmra.mrb[56].mxu1 %vm559_vm1, %v1557_v62  ;;  %v1550_v8 = vmax.f32 %v1530_v2, 0.0 }
 0x49b   : > { %v1525_v7 = vadd.f32 %v2617_v29, %v1524_v6  ;;  %v1548_v10 = vmax.f32 %v1522_v4, 0.0 }
 0x49c   : > { %v1551_v9 = vmax.f32 %v1533_v5, 0.0 }
 0x49d   : > { %v1549_v11 = vmax.f32 %v1525_v7, 0.0 }
 0x49e   : > { %v1559_v12 = vpack.c.bf16 %v1551_v9, %v1550_v8 }
 0x49f   : > { %v1558_v13 = vpack.c.bf16 %v1549_v11, %v1548_v10 }
 0x4a1   : > { %2339 = vmatprep.mubr.msk.bf16.mxu1 %vm559_vm1, %v1558_v13 }
 0x4a2   : > { %2340 = vmatmul.mubr.msk.bf16.gmra.mrb[60].mxu1 %vm559_vm1, %v1559_v12 }
 0x55d   : > { %v2329_v14 = vpop.f32.mrb[48].mxu1 }
 0x55e   : > { %v1618_v15 = vpop.f32.mrb[49].mxu1  ;;  %v1627_v17 = vadd.f32 %v2329_v14, %v2677_v27 }
 0x55f   : > { %v2330_v16 = vpop.f32.mrb[50].mxu1  ;;  %v1619_v19 = vadd.f32 %v2677_v27, %v1618_v15 }
 0x560   : > { %v1630_v18 = vadd.f32 %v2330_v16, %v2677_v27  ;;  %v1621_v29 = vpop.f32.mrb[51].mxu1 }
 0x561   : > { %v1622_v20 = vadd.f32 %v2677_v27, %v1621_v29 }
 0x562   : > { %v2050_v21 = vpack.c.bf16 %v1630_v18, %v1627_v17 }
 0x563   : > { %v2045_v22 = vpack.c.bf16 %v1622_v20, %v1619_v19 }
 0x564   : > { %2090 = vst [vmem:[%s2686_s26 + $0x48] sm:$0xff] %v2050_v21  }
 0x565   : > { %2089 = vst [vmem:[%s2686_s26 + $0x40] sm:$0xff] %v2045_v22   ;;  %v2333_v31 = vpop.f32.mrb[52].mxu1 }
 0x566   : > { %v1634_v23 = vpop.f32.mrb[53].mxu1  ;;  %v1643_v33 = vadd.f32 %v2333_v31, %v2677_v27 }
 0x567   : > { %v2334_v34 = vpop.f32.mrb[54].mxu1  ;;  %v1635_v36 = vadd.f32 %v2677_v27, %v1634_v23 }
 0x568   : > { %v1646_v35 = vadd.f32 %v2334_v34, %v2677_v27  ;;  %v1637_v25 = vpop.f32.mrb[55].mxu1 }
 0x569   : > { %v1638_v37 = vadd.f32 %v2677_v27, %v1637_v25 }
 0x56a   : > { %v2060_v32 = vpack.c.bf16 %v1646_v35, %v1643_v33 }
 0x56b   : > { %v2055_v38 = vpack.c.bf16 %v1638_v37, %v1635_v36 }
 0x56c   : > { %2092 = vst [vmem:[%s2686_s26 + $0x58] sm:$0xff] %v2060_v32  }
 0x56d   : > { %2091 = vst [vmem:[%s2686_s26 + $0x50] sm:$0xff] %v2055_v38   ;;  %v2337_v39 = vpop.f32.mrb[56].mxu1 }
 0x56e   : > { %v1650_v26 = vpop.f32.mrb[57].mxu1  ;;  %v1659_v41 = vadd.f32 %v2337_v39, %v2677_v27 }
 0x56f   : > { %v2338_v40 = vpop.f32.mrb[58].mxu1  ;;  %v1651_v44 = vadd.f32 %v2677_v27, %v1650_v26 }
 0x570   : > { %v1662_v42 = vadd.f32 %v2338_v40, %v2677_v27  ;;  %v1653_v43 = vpop.f32.mrb[59].mxu1 }
 0x571   : > { %v1654_v45 = vadd.f32 %v2677_v27, %v1653_v43 }
 0x572   : > { %v2070_v46 = vpack.c.bf16 %v1662_v42, %v1659_v41 }
 0x573   : > { %v2065_v47 = vpack.c.bf16 %v1654_v45, %v1651_v44 }
 0x574   : > { %2094 = vst [vmem:[%s2686_s26 + $0x68] sm:$0xff] %v2070_v46  }
 0x575   : > { %2093 = vst [vmem:[%s2686_s26 + $0x60] sm:$0xff] %v2065_v47   ;;  %v2341_v48 = vpop.f32.mrb[60].mxu1 }
 0x576   : > { %v1666_v49 = vpop.f32.mrb[61].mxu1  ;;  %v1675_v51 = vadd.f32 %v2341_v48, %v2677_v27 }
 0x577   : > { %v2342_v50 = vpop.f32.mrb[62].mxu1  ;;  %v1667_v54 = vadd.f32 %v2677_v27, %v1666_v49 }
 0x578   : > { %v1678_v52 = vadd.f32 %v2342_v50, %v2677_v27  ;;  %v1669_v53 = vpop.f32.mrb[63].mxu1 }
 0x579   : > { %v1670_v30 = vadd.f32 %v2677_v27, %v1669_v53 }
 0x57a   : > { %v2080_v55 = vpack.c.bf16 %v1678_v52, %v1675_v51 }
 0x57b   : > { %v2075_v28 = vpack.c.bf16 %v1670_v30, %v1667_v54 }
 0x57c   : > { %2096 = vst [vmem:[%s2686_s26 + $0x78] sm:$0xff] %v2080_v55  }
 0x57d   : > { %2095 = vst [vmem:[%s2686_s26 + $0x70] sm:$0xff] %v2075_v28  }
 0x57e PF: > { %s19_s30 = sadd.s32 1, %s2366_s30  }
 0x57f   : > { %p16_p4 = scmp.ge.s32.totalorder %s19_s30, 4  }
 0x581   :  { %18 = sbr.rel (!%p16_p4) target bundleno = 1 (0x1), region = 88 }

</bundles_post_ra>
